<compile_context>
chip_gen: v6e
topology: v6e:2x2x1
jax: 0.10.0
libtpu: 0.0.40
codegen_flags: <defaults>
</compile_context>

<pallas_src>
import functools

import jax
import jax.numpy as jnp
from jax.experimental import pallas as pl
from jax.experimental.pallas import tpu as pltpu


def _lorentz_exp0_kernel(u_ref, o_ref, *, k: float, eps: float):
    u = u_ref[...].astype(jnp.float32)                      # (tile_n, D)

    sqrt_k = jnp.float32(float(k) ** 0.5)
    inv_sqrt_k = jnp.float32(1.0 / (float(k) ** 0.5))

    # Row-wise squared norm: XLU lane reduction -> (tile_n, 1).
    sq = jnp.sum(u * u, axis=-1, keepdims=True)
    norm = jnp.maximum(jnp.sqrt(sq), jnp.float32(eps))      # same clamp as reference
    inv_norm = 1.0 / norm                                   # one exact per-row reciprocal
    theta = norm * inv_sqrt_k

    # cosh/sinh from a single exp + one reciprocal (instead of jnp.cosh + jnp.sinh,
    # which lower to ~4 exps per row). Exact (non-approx) reciprocal keeps 1e-5 accuracy.
    e = jnp.exp(theta)                                      # (tile_n, 1), EUP
    inv_e = 1.0 / e
    cosh_t = 0.5 * (e + inv_e)
    sinh_t = 0.5 * (e - inv_e)

    x_time = sqrt_k * cosh_t                                # (tile_n, 1)

    # Fold the full-width divide u/||u|| into a per-row scale: one reciprocal/row,
    # then a broadcast VPU multiply over the D lanes.
    scale = (sqrt_k * sinh_t) * inv_norm                    # (tile_n, 1)
    x_space = u * scale                                     # (tile_n, D)

    # Single fused output tile stored dense at lane offset 0 (only the tail vreg of the
    # (D+1)-wide row is a masked store). The lane shift placing x_space at column 1 is
    # in-register XLU work, hidden under DMA; avoids an extra HBM round-trip that a
    # wrapper-side stitch of two outputs would cost.
    out = jnp.concatenate([x_time, x_space], axis=-1)       # (tile_n, D+1)
    o_ref[...] = out.astype(o_ref.dtype)


def lorentz_exp0(u: jax.Array, k: float, *, eps: float = 1e-7,
                 tile_n: int | None = None,
                 vmem_budget_bytes: int = 8 * 1024 * 1024) -> jax.Array:
    """Pallas implementation of the Lorentz exp map at the origin.

    u: (..., D) tangent vectors; returns (..., D+1) hyperboloid points.
    """
    orig_shape = u.shape
    D = orig_shape[-1]
    u2d = u.reshape(-1, D)                                  # free for contiguous inputs
    N = u2d.shape[0]

    # Row-tile sizing: cap the double-buffered footprint 2 * (in_tile + out_tile)
    # at vmem_budget_bytes (safe under v5e's 16 MiB scoped default and v7x's VMEM),
    # keep it a multiple of 8 (sublane), and never larger than the (rounded-up) data.
    itemsize = jnp.dtype(u.dtype).itemsize
    row_bytes = (D + (D + 1)) * itemsize
    if tile_n is None:
        tile_n = vmem_budget_bytes // (2 * row_bytes)
    n_ceil = ((N + 7) // 8) * 8
    tile_n = min(int(tile_n), n_ceil)
    tile_n = max(8, (tile_n // 8) * 8)

    grid = (pl.cdiv(N, tile_n),)                            # ragged last block masked
    kernel = functools.partial(_lorentz_exp0_kernel, k=float(k), eps=float(eps))

    out = pl.pallas_call(
        kernel,
        out_shape=jax.ShapeDtypeStruct((N, D + 1), u.dtype),
        grid_spec=pltpu.PrefetchScalarGridSpec(
            num_scalar_prefetch=0,
            grid=grid,
            in_specs=[pl.BlockSpec((tile_n, D), lambda i: (i, 0))],
            out_specs=pl.BlockSpec((tile_n, D + 1), lambda i: (i, 0)),
        ),
        compiler_params=pltpu.CompilerParams(
            dimension_semantics=("parallel",)),              # shards rows across TCs (v7x)
    )(u2d)

    return out.reshape(*orig_shape[:-1], D + 1)


def _lorentz_exp0_ref(u, k, eps=1e-7):
    sqrt_k = jnp.float32(k) ** 0.5
    u_norm = jnp.maximum(
        jnp.sqrt(jnp.sum(u.astype(jnp.float32) ** 2, axis=-1, keepdims=True)),
        jnp.float32(eps))
    theta = u_norm / sqrt_k
    x_time = sqrt_k * jnp.cosh(theta)
    x_space = sqrt_k * jnp.sinh(theta) * u / u_norm
    return jnp.concatenate([x_time, x_space], axis=-1).astype(u.dtype)


if __name__ == "__main__":
    # Module "parameters": LorentzExp0 only carries the curvature scalar k.
    K = 1.0

    key = jax.random.PRNGKey(0)
    # batch=2, seq=8, hidden=32 tangent dims -> output hidden 33
    u = jax.random.normal(key, (2, 8, 32), dtype=jnp.float32)

    x = lorentz_exp0(u, K)
    x = jax.block_until_ready(x)

    x_ref = _lorentz_exp0_ref(u, K)
    assert x.shape == (2, 8, 33), x.shape
    assert jnp.allclose(x, x_ref, atol=1e-5, rtol=1e-5), "mismatch vs. reference"

    print("KERNEL_OK")
</pallas_src>

<mosaic_0001>
module attributes {stable_mosaic.version = 11 : i64} {
  func.func @_lorentz_exp0_kernel(%arg0: i32, %arg1: memref<16x32xf32, #tpu.memory_space<vmem>>, %arg2: memref<16x33xf32, #tpu.memory_space<vmem>>) attributes {dimension_semantics = [#tpu.dimension_semantics<parallel>], iteration_bounds = array<i64: 1>, scalar_prefetch = 0 : i64, scratch_operands = 0 : i64, tpu.core_type = #tpu.core_type<tc>, window_params = [{transform_indices = @transform_0, window_bounds = array<i64: 16, 32>}, {transform_indices = @transform_1, window_bounds = array<i64: 16, 33>}]} {
    %c0 = arith.constant 0 : index
    %c0_0 = arith.constant 0 : index
    %0 = vector.load %arg1[%c0, %c0_0] : memref<16x32xf32, #tpu.memory_space<vmem>>, vector<16x32xf32>
    %1 = arith.mulf %0, %0 : vector<16x32xf32>
    %cst = arith.constant dense<0.000000e+00> : vector<16xf32>
    %2 = vector.multi_reduction <add>, %1, %cst [1] : vector<16x32xf32> to vector<16xf32>
    %3 = vector.shape_cast %2 : vector<16xf32> to vector<16x1xf32>
    %4 = math.sqrt %3 : vector<16x1xf32>
    %cst_1 = arith.constant 1.000000e-07 : f32
    %5 = vector.broadcast %cst_1 : f32 to vector<16x1xf32>
    %6 = arith.maximumf %4, %5 : vector<16x1xf32>
    %cst_2 = arith.constant 1.000000e+00 : f32
    %7 = vector.broadcast %cst_2 : f32 to vector<16x1xf32>
    %8 = arith.divf %7, %6 : vector<16x1xf32>
    %cst_3 = arith.constant 1.000000e+00 : f32
    %9 = vector.broadcast %cst_3 : f32 to vector<16x1xf32>
    %10 = arith.mulf %6, %9 : vector<16x1xf32>
    %11 = math.exp %10 : vector<16x1xf32>
    %cst_4 = arith.constant 1.000000e+00 : f32
    %12 = vector.broadcast %cst_4 : f32 to vector<16x1xf32>
    %13 = arith.divf %12, %11 : vector<16x1xf32>
    %14 = arith.addf %11, %13 : vector<16x1xf32>
    %cst_5 = arith.constant 5.000000e-01 : f32
    %15 = vector.broadcast %cst_5 : f32 to vector<16x1xf32>
    %16 = arith.mulf %15, %14 : vector<16x1xf32>
    %17 = arith.subf %11, %13 : vector<16x1xf32>
    %cst_6 = arith.constant 5.000000e-01 : f32
    %18 = vector.broadcast %cst_6 : f32 to vector<16x1xf32>
    %19 = arith.mulf %18, %17 : vector<16x1xf32>
    %cst_7 = arith.constant 1.000000e+00 : f32
    %20 = vector.broadcast %cst_7 : f32 to vector<16x1xf32>
    %21 = arith.mulf %20, %16 : vector<16x1xf32>
    %cst_8 = arith.constant 1.000000e+00 : f32
    %22 = vector.broadcast %cst_8 : f32 to vector<16x1xf32>
    %23 = arith.mulf %22, %19 : vector<16x1xf32>
    %24 = arith.mulf %23, %8 : vector<16x1xf32>
    %25 = vector.broadcast %24 : vector<16x1xf32> to vector<16x32xf32>
    %26 = arith.mulf %0, %25 : vector<16x32xf32>
    %27 = tpu.concatenate %21, %26 in 1 : vector<16x1xf32>, vector<16x32xf32> -> vector<16x33xf32>
    %c0_9 = arith.constant 0 : index
    %c0_10 = arith.constant 0 : index
    %28 = vector.load %arg2[%c0_9, %c0_10] : memref<16x33xf32, #tpu.memory_space<vmem>>, vector<16x33xf32>
    tpu.vector_store %arg2[%c0_9, %c0_10], %27 {strides = array<i32>} : memref<16x33xf32, #tpu.memory_space<vmem>>, vector<16x33xf32>,
    return
  }
  func.func @transform_0(%arg0: i32) -> (i32, i32) {
    %c0_i32 = arith.constant 0 : i32
    %c0_i32_0 = arith.constant 0 : i32
    return %arg0, %c0_i32 : i32, i32
  }
  func.func @transform_1(%arg0: i32) -> (i32, i32) {
    %c0_i32 = arith.constant 0 : i32
    %c0_i32_0 = arith.constant 0 : i32
    return %arg0, %c0_i32 : i32, i32
  }
}

</mosaic_0001>

<bundles_post_ra>
// kernel: tpu_custom_call.1
= control target key start
LH: loop header
LB: loop body
LE: loop exit
PB: predicated region body
PF: predicated region fallthrough
CT: control target
= control target key end

     0   :  { %6 = vsyncpa [#allocation3], 0  ;;  %s197_s0 = inlined_call_operand.hbm [shape: f32[16,32], index: 0, kind: input, shape index: {}]   ;;  %s198_s1 = inlined_call_operand.hbm [shape: f32[16,33], index: 1, kind: output, shape index: {}]  }
   0x1   :  { %7 = vsyncpa [#allocation4], 0  ;;  %s170_s6 = smov [#allocation2]  }
   0x2   :  { %s13_s7 = sshll.u32 %s170_s6, 4  ;;  %s14_s7 = int_to_ptr.vmem [resolvable:$true] %s13_s7 }
   0x3   :  { %s134_s8 = scalar_lea.vmem %s14_s7, 256  ;;  %p139_p1 = scmp.lt.s32.totalorder %s14_s7, %s14_s7 }
   0x4   :  { %p135_p0 = scmp.ne.s32.totalorder %s14_s7, %s134_s8  ;;  %p140_p2 = scmp.lt.s32.totalorder %s134_s8, %s134_s8 }
   0x6   :  { %p141_p3 = por %p140_p2, %p139_p1 }
   0x8   :  { %p142_p4 = pnand %p141_p3, %p135_p0 }
   0xa   :  { %145 = shalt.err (!%p142_p4)
}
   0xb   :  { %s171_s9 = smov 128   ;;  %s172_s10 = smov 8  }
   0xc   :  { %19 = dma.hbm_to_vmem [thread:$0]  %s197_s0, 256, %s14_s7, [#allocation3], %s171_s9, %s171_s9, %s172_s10  }
   0xd   :  { %166 = dma.done.wait [#allocation3], 256  }
   0xe   :  { %167 = vsyncadd [#allocation3], 4294967040  ;;  %v23_v0 = vld [vmem:[#allocation2] sm:$0xff]  ;;  %vm27_vm0 = vcmask 261120   ;;  %v24_v1 = vld [vmem:[#allocation2 + $0x8] sm:$0xff]  ;;  %s173_s0 = smov 1  }
   0xf   :  { %v25_v2 = vmul.f32 %v23_v0, %v23_v0  ;;  %v26_v3 = vmul.f32 %v24_v1, %v24_v1  ;;  %vm82_vm5 = vcmask 7168   ;;  %vm85_vm6 = vcmask 269312   ;;  %s174_s13 = smov [#allocation5]  }
  0x10   :  { %s93_s14 = sshll.u32 %s174_s13, 4  ;;  %s94_s14 = int_to_ptr.vmem [resolvable:$true] %s93_s14 }
  0x11   :  { %v28_v4 = vsel %vm27_vm0, %v25_v2, 0.0  ;;  %v31_v5 = vsel %vm27_vm0, %v26_v3, 0.0  ;;  %s146_s15 = scalar_lea.vmem %s94_s14, 256  ;;  %p151_p6 = scmp.lt.s32.totalorder %s94_s14, %s94_s14 }
  0x12   :  { %29 = vadd.xlane.f32.xlu0 %v28_v4  ;;  %p147_p5 = scmp.ne.s32.totalorder %s94_s14, %s146_s15  ;;  %p152_p7 = scmp.lt.s32.totalorder %s146_s15, %s146_s15 }
  0x14   :  { %p153_p8 = por %p152_p7, %p151_p6 }
  0x16   :  { %32 = vadd.xlane.f32.xlu0 %v31_v5  ;;  %p154_p9 = pnand %p153_p8, %p147_p5 }
  0x9b   :  { %v30_v6 = vpop.xlane.xlu0 %29 }
  0x9c   :  { %110 = vrsqrt.f32 %v30_v6  ;;  %vm36_vm1 = vcmp.eq.f32.partialorder %v30_v6, inf  ;;  %v39_v10 = vand.u32 2147483648, %v30_v6  ;;  %vm38_vm2 = vcmp.eq.f32.partialorder %v30_v6, 0.0 }
  0x9f   :  { %v33_v7 = vpop.xlane.xlu0 %32 }
  0xa0   :  { %112 = vrsqrt.f32 %v33_v7  ;;  %vm43_vm3 = vcmp.eq.f32.partialorder %v33_v7, inf  ;;  %v46_v16 = vand.u32 2147483648, %v33_v7  ;;  %vm45_vm4 = vcmp.eq.f32.partialorder %v33_v7, 0.0 }
  0xa9   :  { %v111_v8 = vpop.eup %110 }
  0xaa   :  { %v35_v9 = vmul.f32 %v111_v8, %v30_v6 }
  0xac   :  { %v37_v11 = vsel %vm36_vm1, %v30_v6, %v35_v9 }
  0xad   :  { %v113_v12 = vpop.eup %112  ;;  %v40_v13 = vsel %vm38_vm2, %v39_v10, %v37_v11 }
  0xae   :  { %v48_v14 = vmax.f32 %v40_v13, 1e-07  ;;  %v42_v15 = vmul.f32 %v113_v12, %v33_v7 }
  0xb0   :  { %v54_v17 = vmul.f32 1.442695, %v48_v14  ;;  %v44_v18 = vsel %vm43_vm3, %v33_v7, %v42_v15 }
  0xb1   :  { %v47_v19 = vsel %vm45_vm4, %v46_v16, %v44_v18 }
  0xb2   :  { %114 = vpow2.f32 %v54_v17  ;;  %v49_v20 = vmax.f32 %v47_v19, 1e-07 }
  0xb4   :  { %v56_v21 = vmul.f32 1.442695, %v49_v20 }
  0xb6   :  { %116 = vpow2.f32 %v56_v21 }
  0xbf   :  { %v115_v22 = vpop.eup %114 }
  0xc0   :  { %118 = vrcp.f32 %v115_v22 }
  0xc1   :  { %120 = vrcp.f32 %v48_v14 }
  0xc3   :  { %v117_v23 = vpop.eup %116 }
  0xc4   :  { %122 = vrcp.f32 %v117_v23 }
  0xc5   :  { %124 = vrcp.f32 %v49_v20 }
  0xcd   :  { %v119_v24 = vpop.eup %118 }
  0xce   :  { %v66_v25 = vsub.f32 %v115_v22, %v119_v24  ;;  %v62_v26 = vadd.f32 %v119_v24, %v115_v22  ;;  %v121_v27 = vpop.eup %120 }
  0xd0   :  { %v68_v28 = vmul.f32 0.5, %v66_v25  ;;  %v64_v38 = vmul.f32 0.5, %v62_v26 }
  0xd1   :  { %v123_v29 = vpop.eup %122 }
  0xd2   :  { %v70_v30 = vmul.f32 %v121_v27, %v68_v28  ;;  %v67_v31 = vsub.f32 %v117_v23, %v123_v29  ;;  %v63_v32 = vadd.f32 %v123_v29, %v117_v23  ;;  %v125_v35 = vpop.eup %124 }
  0xd4   :  { %v72_v33 = vmul.f32 %v70_v30, %v23_v0  ;;  %v69_v34 = vmul.f32 0.5, %v67_v31  ;;  %v65_v41 = vmul.f32 0.5, %v63_v32 }
  0xd6   :  { %76 = vrot.lane.b32.xlu1 %v72_v33, %s173_s0  ;;  %v71_v36 = vmul.f32 %v125_v35, %v69_v34 }
  0xd8   :  { %v73_v37 = vmul.f32 %v71_v36, %v24_v1 }
  0xda   :  { %78 = vrot.lane.b32.xlu1 %v73_v37, %s173_s0 }
 0x148   :  { %v77_v39 = vpop.permute.xlu1 %76 }
 0x149   :  { %v83_v40 = vsel %vm82_vm5, %v64_v38, %v77_v39 }
 0x14a   :  { %86 = vst.msk [vmem:[#allocation5] sm:$0xff] %vm85_vm6, %v83_v40 }
 0x14c   :  { %v79_v42 = vpop.permute.xlu1 %78 }
 0x14d   :  { %v84_v43 = vsel %vm82_vm5, %v65_v41, %v79_v42 }
 0x14e   :  { %87 = vst.msk [vmem:[#allocation5 + $0x8] sm:$0xff] %vm85_vm6, %v84_v43 }
 0x14f   :  { %157 = shalt.err (!%p154_p9)
}
 0x150   :  { %99 = dma.vmem_to_hbm [thread:$0]  %s94_s14, 256, %s198_s1, [#allocation4], %s171_s9, %s171_s9, %s172_s10  }
 0x151   :  { %168 = dma.done.wait [#allocation4], 256  }
 0x152   :  { %169 = vsyncadd [#allocation4], 4294967040 }
 0x153   :  { %103 = vsyncpa [#allocation3], 1 }
 0x154   :  { %104 = vsyncpa [#allocation4], 1 }

</bundles_post_ra>
